<compile_context>
chip_gen: v7x
topology: tpu7x:2x2x1
jax: 0.10.0
libtpu: 0.0.40
codegen_flags: <defaults>
</compile_context>

<pallas_src>
import jax
import jax.numpy as jnp
from jax.experimental import pallas as pl
from jax.experimental.pallas import tpu as pltpu


def zero_conv2d_kernel(x_ref, wp_ref, wn_ref, b_ref, o_ref):
    """Fused concat_elu + 1x1 conv on one (batch, pixel-tile) block.

    x_ref : (C, TP)     channels on sublanes, pixels on lanes
    wp_ref: (Cout, C)   weight half applied to elu(x)
    wn_ref: (Cout, C)   weight half applied to elu(-x)
    b_ref : (Cout, 1)
    o_ref : (Cout, TP)
    """
    x = x_ref[...].astype(jnp.float32)                     # (C, TP)

    # concat_elu with a single EUP exp per element:
    #   e = exp(-|x|) - 1  equals elu(x) where x<=0 and elu(-x) where x>0.
    e = jnp.exp(-jnp.abs(x)) - 1.0
    h_pos = jnp.where(x > 0, x, e)                         # elu(x)
    h_neg = jnp.where(x > 0, e, -x)                        # elu(-x)

    wp = wp_ref[...].astype(jnp.float32)                   # (Cout, C)
    wn = wn_ref[...].astype(jnp.float32)                   # (Cout, C)
    out = (jnp.dot(wp, h_pos, preferred_element_type=jnp.float32)
           + jnp.dot(wn, h_neg, preferred_element_type=jnp.float32)
           + b_ref[...].astype(jnp.float32))               # (Cout, TP)

    o_ref[...] = out.astype(o_ref.dtype)


def _choose_tile_p(num_pixels, max_tile=2048):
    """Largest lane-dense pixel tile: whole row if small, else a multiple of
    128 that divides the pixel count."""
    if num_pixels <= max_tile:
        return num_pixels
    for t in range(max_tile, 0, -128):
        if num_pixels % t == 0:
            return t
    return num_pixels  # fallback: single tile spanning the full pixel axis


def zero_conv2d_pallas(x_nchw, weight, bias, *, max_tile_p=2048):
    """x_nchw: (N, C, H, W).  weight: (Cout, 2C) (1x1 kernel squeezed), bias: (Cout,)."""
    N, C, H, W = x_nchw.shape
    Cout = weight.shape[0]
    assert weight.shape == (Cout, 2 * C)

    P = H * W
    tile_p = _choose_tile_p(P, max_tile_p)
    assert P % tile_p == 0, "pixel tile must divide H*W"

    # Free reshape: NCHW stays contiguous, pixels land on the lane axis.
    x3 = x_nchw.reshape(N, C, P)

    # Pre-split the conv weight so the kernel never slices sub-tile halves.
    w_pos = weight[:, :C]                     # acts on elu(x)
    w_neg = weight[:, C:]                     # acts on elu(-x)
    b2 = bias.reshape(Cout, 1)

    out3 = pl.pallas_call(
        zero_conv2d_kernel,
        out_shape=jax.ShapeDtypeStruct((N, Cout, P), x_nchw.dtype),
        grid_spec=pltpu.PrefetchScalarGridSpec(
            num_scalar_prefetch=0,
            grid=(N, P // tile_p),
            in_specs=[
                pl.BlockSpec((None, C, tile_p), lambda n, p: (n, 0, p)),  # x tile
                pl.BlockSpec((Cout, C), lambda n, p: (0, 0)),             # w_pos
                pl.BlockSpec((Cout, C), lambda n, p: (0, 0)),             # w_neg
                pl.BlockSpec((Cout, 1), lambda n, p: (0, 0)),             # bias
            ],
            out_specs=pl.BlockSpec((None, Cout, tile_p), lambda n, p: (n, 0, p)),
        ),
        compiler_params=pltpu.CompilerParams(
            dimension_semantics=("parallel", "parallel"),
            vmem_limit_bytes=32 * 1024 * 1024,   # safe on v7x's 64 MiB VMEM too
        ),
    )(x3, w_pos, w_neg, b2)

    return out3.reshape(N, Cout, H, W)


# ----------------------------- pure-JAX reference ---------------------------
def zero_conv2d_ref(x_nchw, weight, bias):
    h = jax.nn.elu(jnp.concatenate([x_nchw, -x_nchw], axis=1))       # (N, 2C, H, W)
    out = jnp.einsum('oc,nchw->nohw', weight, h)
    return out + bias[None, :, None, None]


if __name__ == "__main__":
    # Module spec: ZeroConv2d(in_channel=2*C, out_channel); x has C channels.
    N, C, H, W = 2, 4, 16, 16
    Cout = 4

    key = jax.random.PRNGKey(0)
    kx, kw, kb = jax.random.split(key, 3)
    x = jax.random.normal(kx, (N, C, H, W), dtype=jnp.float32)

    # ZeroConv2d initialization: weight and bias are zero.
    w_zero = jnp.zeros((Cout, 2 * C), dtype=jnp.float32)
    b_zero = jnp.zeros((Cout,), dtype=jnp.float32)

    out = jax.block_until_ready(zero_conv2d_pallas(x, w_zero, b_zero))
    assert out.shape == (N, Cout, H, W)
    assert jnp.allclose(out, zero_conv2d_ref(x, w_zero, b_zero),
                        atol=1e-5, rtol=1e-5), "mismatch vs reference (zero init)"

    # Same forward pass with non-zero weights, so the concat_elu + conv math is
    # actually exercised numerically (zero init trivially yields zeros).
    w_rnd = jax.random.normal(kw, (Cout, 2 * C), dtype=jnp.float32) * 0.1
    b_rnd = jax.random.normal(kb, (Cout,), dtype=jnp.float32) * 0.1
    out2 = jax.block_until_ready(zero_conv2d_pallas(x, w_rnd, b_rnd))
    assert jnp.allclose(out2, zero_conv2d_ref(x, w_rnd, b_rnd),
                        atol=1e-5, rtol=1e-5), "mismatch vs reference (random weights)"

    print("KERNEL_OK")
</pallas_src>

<mosaic_0001>
module attributes {stable_mosaic.version = 11 : i64} {
  func.func @zero_conv2d_kernel(%arg0: i32, %arg1: i32, %arg2: memref<1x4x256xf32, #tpu.memory_space<vmem>>, %arg3: memref<4x4xf32, #tpu.memory_space<vmem>>, %arg4: memref<4x4xf32, #tpu.memory_space<vmem>>, %arg5: memref<4x1xf32, #tpu.memory_space<vmem>>, %arg6: memref<1x4x256xf32, #tpu.memory_space<vmem>>) attributes {dimension_semantics = [#tpu.dimension_semantics<parallel>, #tpu.dimension_semantics<parallel>], iteration_bounds = array<i64: 2, 1>, scalar_prefetch = 0 : i64, scratch_operands = 0 : i64, tpu.core_type = #tpu.core_type<tc>, window_params = [{transform_indices = @transform_0, window_bounds = array<i64: 1, 4, 256>}, {pipeline_mode = #tpu.pipeline_mode<synchronous>, transform_indices = @transform_1, window_bounds = array<i64: 4, 4>}, {pipeline_mode = #tpu.pipeline_mode<synchronous>, transform_indices = @transform_2, window_bounds = array<i64: 4, 4>}, {pipeline_mode = #tpu.pipeline_mode<synchronous>, transform_indices = @transform_3, window_bounds = array<i64: 4, 1>}, {transform_indices = @transform_4, window_bounds = array<i64: 1, 4, 256>}]} {
    %c0 = arith.constant 0 : index
    %c0_0 = arith.constant 0 : index
    %c0_1 = arith.constant 0 : index
    %0 = vector.load %arg2[%c0, %c0_0, %c0_1] : memref<1x4x256xf32, #tpu.memory_space<vmem>>, vector<1x4x256xf32>
    %1 = vector.shape_cast %0 : vector<1x4x256xf32> to vector<4x256xf32>
    %2 = math.absf %1 : vector<4x256xf32>
    %cst = arith.constant 0.000000e+00 : f32
    %3 = vector.broadcast %cst : f32 to vector<4x256xf32>
    %4 = arith.subf %3, %2 : vector<4x256xf32>
    %5 = math.exp %4 : vector<4x256xf32>
    %cst_2 = arith.constant 1.000000e+00 : f32
    %6 = vector.broadcast %cst_2 : f32 to vector<4x256xf32>
    %7 = arith.subf %5, %6 : vector<4x256xf32>
    %cst_3 = arith.constant 0.000000e+00 : f32
    %8 = vector.broadcast %cst_3 : f32 to vector<4x256xf32>
    %9 = arith.cmpf ogt, %1, %8 : vector<4x256xf32>
    %10 = arith.select %9, %1, %7 : vector<4x256xi1>, vector<4x256xf32>
    %cst_4 = arith.constant 0.000000e+00 : f32
    %11 = vector.broadcast %cst_4 : f32 to vector<4x256xf32>
    %12 = arith.cmpf ogt, %1, %11 : vector<4x256xf32>
    %cst_5 = arith.constant 0.000000e+00 : f32
    %13 = vector.broadcast %cst_5 : f32 to vector<4x256xf32>
    %14 = arith.subf %13, %1 : vector<4x256xf32>
    %15 = arith.select %12, %7, %14 : vector<4x256xi1>, vector<4x256xf32>
    %c0_6 = arith.constant 0 : index
    %c0_7 = arith.constant 0 : index
    %16 = vector.load %arg3[%c0_6, %c0_7] : memref<4x4xf32, #tpu.memory_space<vmem>>, vector<4x4xf32>
    %c0_8 = arith.constant 0 : index
    %c0_9 = arith.constant 0 : index
    %17 = vector.load %arg4[%c0_8, %c0_9] : memref<4x4xf32, #tpu.memory_space<vmem>>, vector<4x4xf32>
    %cst_10 = arith.constant dense<0.000000e+00> : vector<4x256xf32>
    %18 = tpu.matmul %16, %10, %cst_10 {dimension_numbers = #tpu.dot_dimension_numbers<[1], [0], [0], [1], [0, 0, 1, 1], [], []>} : vector<4x4xf32>, vector<4x256xf32>, vector<4x256xf32> -> vector<4x256xf32>
    %cst_11 = arith.constant dense<0.000000e+00> : vector<4x256xf32>
    %19 = tpu.matmul %17, %15, %cst_11 {dimension_numbers = #tpu.dot_dimension_numbers<[1], [0], [0], [1], [0, 0, 1, 1], [], []>} : vector<4x4xf32>, vector<4x256xf32>, vector<4x256xf32> -> vector<4x256xf32>
    %20 = arith.addf %18, %19 : vector<4x256xf32>
    %c0_12 = arith.constant 0 : index
    %c0_13 = arith.constant 0 : index
    %21 = vector.load %arg5[%c0_12, %c0_13] : memref<4x1xf32, #tpu.memory_space<vmem>>, vector<4x1xf32>
    %22 = vector.broadcast %21 : vector<4x1xf32> to vector<4x256xf32>
    %23 = arith.addf %20, %22 : vector<4x256xf32>
    %c0_14 = arith.constant 0 : index
    %c0_15 = arith.constant 0 : index
    %c0_16 = arith.constant 0 : index
    %24 = vector.load %arg6[%c0_14, %c0_15, %c0_16] : memref<1x4x256xf32, #tpu.memory_space<vmem>>, vector<1x4x256xf32>
    %25 = vector.shape_cast %24 : vector<1x4x256xf32> to vector<4x256xf32>
    %26 = vector.shape_cast %23 : vector<4x256xf32> to vector<1x4x256xf32>
    tpu.vector_store %arg6[%c0_14, %c0_15, %c0_16], %26 {strides = array<i32>} : memref<1x4x256xf32, #tpu.memory_space<vmem>>, vector<1x4x256xf32>,
    return
  }
  func.func @transform_0(%arg0: i32, %arg1: i32) -> (i32, i32, i32) {
    %c0_i32 = arith.constant 0 : i32
    %c0_i32_0 = arith.constant 0 : i32
    return %arg0, %c0_i32, %arg1 : i32, i32, i32
  }
  func.func @transform_1(%arg0: i32, %arg1: i32) -> (i32, i32) {
    %c0_i32 = arith.constant 0 : i32
    %c0_i32_0 = arith.constant 0 : i32
    %c0_i32_1 = arith.constant 0 : i32
    return %c0_i32, %c0_i32_0 : i32, i32
  }
  func.func @transform_2(%arg0: i32, %arg1: i32) -> (i32, i32) {
    %c0_i32 = arith.constant 0 : i32
    %c0_i32_0 = arith.constant 0 : i32
    %c0_i32_1 = arith.constant 0 : i32
    return %c0_i32, %c0_i32_0 : i32, i32
  }
  func.func @transform_3(%arg0: i32, %arg1: i32) -> (i32, i32) {
    %c0_i32 = arith.constant 0 : i32
    %c0_i32_0 = arith.constant 0 : i32
    %c0_i32_1 = arith.constant 0 : i32
    return %c0_i32, %c0_i32_0 : i32, i32
  }
  func.func @transform_4(%arg0: i32, %arg1: i32) -> (i32, i32, i32) {
    %c0_i32 = arith.constant 0 : i32
    %c0_i32_0 = arith.constant 0 : i32
    return %arg0, %c0_i32, %arg1 : i32, i32, i32
  }
}

</mosaic_0001>

<bundles_post_ra>
// kernel: tpu_custom_call.1
= control target key start
LH: loop header
LB: loop body
LE: loop exit
PB: predicated region body
PF: predicated region fallthrough
CT: control target
= control target key end

     0   :  { %9 = vsyncpa [#allocation3], 0  ;;  %s943_s0 = inlined_call_operand.hbm [shape: f32[2,4,256], index: 0, kind: input, shape index: {}]   ;;  %s944_s1 = inlined_call_operand.vmem [shape: f32[4,4], index: 1, kind: input, shape index: {}]   ;;  %s945_s2 = inlined_call_operand.vmem [shape: f32[4,4], index: 2, kind: input, shape index: {}]   ;;  %s946_s3 = inlined_call_operand.vmem [shape: f32[4,1], index: 3, kind: input, shape index: {}]   ;;  %s947_s4 = inlined_call_operand.hbm [shape: f32[2,4,256], index: 4, kind: output, shape index: {}]  }
   0x1   :  { %11 = vsyncpa [#allocation3 + $0x1], 0 }
   0x2   :  { %12 = vsyncpa [#allocation4], 0 }
   0x3   :  { %14 = vsyncpa [#allocation4 + $0x1], 0  ;;  %s758_s15 = smov 0   ;;  %s760_s16 = smov 0  }
   0x4   :  { %s762_s17 = smov 0   ;;  %s764_s18 = smov 0  }
   0x5   :  { %s766_s19 = smov 0   ;;  %s768_s20 = smov 0  }
   0x6 LB: > { %s522_s21 = sadd.s32 4294967295, %s727_s20   ;;  %s523_s22 = sadd.s32 4294967294, %s727_s20   ;;  %s727_s20 = sphi %s768_s20, %s20_s20   ;;  %s723_s19 = sphi %s766_s19, %s963_s19   ;;  %s719_s18 = sphi %s764_s18, %s962_s18   ;;  %s715_s17 = sphi %s762_s17, %s961_s17   ;;  %s711_s16 = sphi %s760_s16, %s960_s16   ;;  %s707_s15 = sphi %s758_s15, %s959_s15  }
   0x7   : > { %s32_s23 = sadd.s32 1, %s723_s19  ;;  %s41_s24 = sadd.s32 1, %s715_s17 }
   0x8   : > { %p34_p0 = scmp.ge.s32.totalorder %s32_s23, 2  ;;  %p48_p1 = scmp.ne.s32.totalorder %s715_s17, %s711_s16 }
   0x9   : > { %p49_p2 = scmp.eq.s32.totalorder %s727_s20, 0  ;;  %p54_p3 = scmp.ne.s32.totalorder %s711_s16, %s707_s15 }
   0xa   : > { %s965_s23 = smov (%p34_p0, %s32_s23), 0  ;;  %p55_p5 = scmp.eq.s32.totalorder %s522_s21, 0 }
   0xb   : > { %p799_p4 = por %p49_p2, %p48_p1  ;;  %s36_s26 = ssub.s32 %s723_s19, %s965_s23 }
   0xc   : > { %p143_p6 = scmp.eq.s32.totalorder %s522_s21, 1  ;;  %p39_p7 = scmp.eq.s32.totalorder %s36_s26, 0 }
   0xd   : > { %p805_p8 = por %p55_p5, %p54_p3  ;;  %p149_p10 = scmp.eq.s32.totalorder %s523_s22, 1 }
   0xe   : > { %p809_p9 = por %p143_p6, %p48_p1  ;;  %p560_p13 = scmp.lt.s32.totalorder %s727_s20, 2 }
   0xf   : > { %s814_s29 = scalar_select %p39_p7, %s715_s17, %s41_s24  }
  0x10   : > { %s951_s28 = scalar_select %p809_p9, 1, 0 }
  0x11   : > { %p816_p11 = por %p149_p10, %p54_p3  ;;  %s178_s5 = sand.u32 1, %s715_s17  }
  0x12   : > { %s526_s6 = sshll.u32 %s178_s5, 3  ;;  %s544_s7 = sshll.u32 %s723_s19, 7 }
  0x13   : > { %s952_s30 = scalar_select %p816_p11, 1, 0 }
  0x14   : > { %s827_s10 = scalar_lea.hbm %s943_s0, %s544_s7  ;;  %s182_s11 = scalar_lea.vmem [#allocation2], %s526_s6 }
  0x15   : > { %s192_s12 = sshll.u32 %s182_s11, 4  ;;  %p833_p0 = pnand %p560_p13, %p799_p4  ;;  %s829_s12 = int_to_ptr.vmem [resolvable:$true] %s192_s12 }
  0x16   : > { %s179_s14 = scalar_lea.sflag [#allocation3], %s178_s5  ;;  %s615_s21 = scalar_lea.hbm %s827_s10, 128 }
  0x17   : > { %p616_p3 = scmp.ne.s32.totalorder %s827_s10, %s615_s21  ;;  %p617_p5 = pneg %p833_p0 }
  0x18   : > { %s620_s25 = scalar_lea.hbm %s943_s0, 256  ;;  %p621_p4 = scmp.lt.u32.totalorder %s827_s10, %s943_s0 }
  0x19   : > { %p618_p6 = pnand %p617_p5, %p616_p3  ;;  %p622_p10 = scmp.lt.u32.totalorder %s620_s25, %s615_s21 }
  0x1a   : > { %p624_p12 = scmp.lt.u32.totalorder %s615_s21, %s827_s10 }
  0x1b   : > { %p619_p7 = pneg %p618_p6  ;;  %p623_p13 = por %p622_p10, %p621_p4 }
  0x1d   : > { %p625_p1 = por %p624_p12, %p623_p13 }
  0x1f   : > { %p626_p2 = pnand %p625_p1, %p619_p7 }
  0x21   : > { %629 = shalt.err (!%p626_p2)
}
  0x22   : > { %s630_s5 = scalar_lea.vmem %s829_s12, 128  ;;  %s729_s7 = smov [#allocation2]  }
  0x23   : > { %p631_p3 = scmp.ne.s32.totalorder %s829_s12, %s630_s5  ;;  %s635_s8 = sshll.u32 %s729_s7, 4  ;;  %s636_s8 = int_to_ptr.vmem [resolvable:$false] %s635_s8 }
  0x24   : > { %s637_s9 = scalar_lea.vmem %s636_s8, 256  ;;  %p638_p9 = scmp.lt.s32.totalorder %s829_s12, %s636_s8 }
  0x25   : > { %p633_p6 = pnand %p631_p3, %p617_p5  ;;  %p639_p4 = scmp.lt.s32.totalorder %s637_s9, %s630_s5 }
  0x27   : > { %p634_p11 = pneg %p633_p6  ;;  %p640_p10 = por %p639_p4, %p638_p9 }
  0x29   : > { %p641_p12 = pnand %p640_p10, %p634_p11 }
  0x2b   : > { %644 = shalt.err (!%p641_p12)
}
  0x2c   : > { %555 = dma.hbm_to_vmem [thread:$0]  (!%p833_p0), %s827_s10, 128, %s829_s12, %s179_s14  }
  0x2d   : > { %p954_p1 = scmp.lt.s32.totalorder %s727_s20, 3  ;;  %p955_p2 = scmp.ge.s32.totalorder %s727_s20, 1 }
  0x2f   : > { %p198_p5 = pnand %p955_p2, %p954_p1 }
  0x30   : > { %s869_s11 = sand.u32 (!%p198_p5), 1, %s711_s16  }
  0x31   : > { %201 = sbr.rel (%p198_p5) target bundleno = 315 (0x13b), region = 36  ;;  %s530_s21 = sshll.u32 (!%p198_p5), %s869_s11, 3 }
  0x32   : > { %s204_s22 = scalar_lea.sflag (!%p198_p5), [#allocation3], %s869_s11  ;;  %s207_s13 = scalar_lea.vmem (!%p198_p5), [#allocation2], %s530_s21 }
  0x38   : > { %698 = dma.done.wait (%p805_p8), %s204_s22, 128  }
  0x39   : > { %700 = vsyncadd (%p805_p8), %s204_s22, 4294967168  ;;  %v730_v0 = vmov 0.0   ;;  %v731_v1 = vmov 0   ;;  %v234_v2 = vld [vmem:[%s207_s13] sm:$0xff]  ;;  %vm252_vm1 = vcmask 1043456   ;;  %vm248_vm2 = vcmask 31744  }
  0x3a   : > { %321 = vmatprep.mubr.f32.mxu1 %v730_v0  ;;  %401 = vmatprep.mubr.f32.mxu0 %v730_v0  ;;  %v235_v3 = vand.u32 2147483647, %v234_v2  ;;  %v408_v4 = vld [vmem:[%s946_s3] sm:$0xf]  ;;  %v242_v7 = vsub.f32 0.0, %v234_v2  ;;  %vm240_vm0 = vcmp.gt.f32.partialorder %v234_v2, 0.0 }
  0x3b   : > { %612 = vset.pattern.permute.xlu0 %v731_v1  ;;  %v245_v14 = vld [vmem:[%s945_s2] sm:$0xf]  ;;  %s545_s26 = sshll.u32 %s719_s18, 7  ;;  %s231_s6 = scalar_lea.vmem [#allocation5], %s530_s21 }
  0x3c   : > { %411 = vperm.xlu0 %612, %v408_v4   ;;  %v236_v5 = vsub.f32 0.0, %v235_v3  ;;  %v244_v15 = vld [vmem:[%s944_s1] sm:$0xf]  ;;  %s438_s5 = sshll.u32 %s231_s6, 4  ;;  %s894_s9 = scalar_lea.hbm %s947_s4, %s545_s26  ;;  %s896_s5 = int_to_ptr.vmem [resolvable:$true] %s438_s5 }
  0x3d   : > { %s422_s22 = scalar_lea.sflag [#allocation4], %s869_s11  ;;  %s645_s13 = scalar_lea.vmem %s896_s5, 128 }
  0x3e   : > { %v237_v6 = vmul.f32 1.442695, %v236_v5  ;;  %p646_p8 = scmp.ne.s32.totalorder %s896_s5, %s645_s13  ;;  %p956_p9 = scmp.ne.s32.totalorder %s951_s28, 0 }
  0x3f   : > { %s732_s18 = smov [#allocation5]  }
  0x40   : > { %613 = vpow2.f32 %v237_v6  ;;  %p647_p11 = pnand %p646_p8, %p956_p9  ;;  %s649_s21 = sshll.u32 %s732_s18, 4  ;;  %s650_s21 = int_to_ptr.vmem [resolvable:$false] %s649_s21 }
  0x41   : > { %s651_s10 = scalar_lea.vmem %s650_s21, 256  ;;  %p652_p7 = scmp.lt.s32.totalorder %s896_s5, %s650_s21 }
  0x42   : > { %p648_p0 = pneg %p647_p11  ;;  %p653_p13 = scmp.lt.s32.totalorder %s651_s10, %s645_s13 }
  0x44   : > { %p654_p3 = por %p653_p13, %p652_p7 }
  0x46   : > { %p655_p6 = pnand %p654_p3, %p648_p0 }
  0x4a   : > { %v614_v8 = vpop.eup %613 }
  0x4b   : > { %v532_v9 = vadd.f32 -1.0, %v614_v8 }
  0x4d   : > { %v243_v10 = vsel %vm240_vm0, %v532_v9, %v242_v7  ;;  %v241_v11 = vsel %vm240_vm0, %v234_v2, %v532_v9 }
  0x4e   : > { %v247_v12 = vcombine.high %v243_v10, %v243_v10  ;;  %v329_v13 = vcombine.high %v241_v11, %v241_v11 }
  0x50   : > { %533 = vmatprep.subr.msk.mxu1 %vm252_vm1, %v247_v12  ;;  %536 = vmatprep.subr.msk.mxu0 %vm252_vm1, %v329_v13 }
  0x51   : > { %534 = vmatpush1.msk.msra.mxu1 %vm252_vm1, %v243_v10  ;;  %537 = vmatpush1.msk.msra.mxu0 %vm252_vm1, %v241_v11 }
  0x52   : > { %535 = vmatmul.mubr.msk.f32.vlgmr.msra.gmra.mrb[0].mxu1 %vm248_vm2, %v245_v14  ;;  %538 = vmatmul.mubr.msk.f32.vlgmr.msra.gmra.mrb[0].mxu0 %vm248_vm2, %v244_v15 }
  0xbb   : > { %v412_v16 = vpop.permute.xlu0 %411 }
 0x125   : > { %v323_v17 = vpop.f32.mrb[0].mxu1  ;;  %v403_v18 = vpop.f32.mrb[0].mxu0 }
 0x126   : > { %v404_v19 = vadd.f32 %v403_v18, %v323_v17  ;;  %v325_v20 = vpop.f32.mrb[1].mxu1  ;;  %v405_v21 = vpop.f32.mrb[1].mxu0 }
 0x127   : > { %v406_v22 = vadd.f32 %v405_v21, %v325_v20 }
 0x128   : > { %v414_v23 = vadd.f32 %v412_v16, %v404_v19 }
 0x129   : > { %v415_v24 = vadd.f32 %v412_v16, %v406_v22 }
 0x12b   : > { %v418_v25 = vcombine.low %v414_v23, %v415_v24 }
 0x12d   : > { %420 = vst [vmem:[%s231_s6] sm:$0xff] %v418_v25 }
 0x12e   : > { %658 = shalt.err (!%p655_p6)
}
 0x12f   : > { %s659_s11 = scalar_lea.hbm %s894_s9, 128  ;;  %s663_s14 = scalar_lea.hbm %s947_s4, 256 }
 0x130   : > { %p660_p4 = scmp.ne.s32.totalorder %s894_s9, %s659_s11  ;;  %p664_p1 = scmp.lt.u32.totalorder %s894_s9, %s947_s4 }
 0x131   : > { %p665_p2 = scmp.lt.u32.totalorder %s663_s14, %s659_s11  ;;  %p667_p8 = scmp.lt.u32.totalorder %s659_s11, %s894_s9 }
 0x132   : > { %p661_p10 = pnand %p660_p4, %p956_p9 }
 0x133   : > { %p666_p5 = por %p665_p2, %p664_p1 }
 0x134   : > { %p662_p12 = pneg %p661_p10 }
 0x135   : > { %p668_p11 = por %p667_p8, %p666_p5 }
 0x137   : > { %p669_p0 = pnand %p668_p11, %p662_p12 }
 0x139   : > { %672 = shalt.err (!%p669_p0)
}
 0x13a   : > { %550 = dma.vmem_to_hbm [thread:$0]  (%p956_p9), %s896_s5, 128, %s894_s9, %s422_s22  }
 0x13b PF: > { %s450_s26 = sand.u32 1, %s707_s15   ;;  %p957_p7 = scmp.ne.s32.totalorder %s952_s30, 0 }
 0x13c   : > { %p958_p13 = scmp.ge.s32.totalorder %s727_s20, 2  ;;  %s451_s6 = scalar_lea.sflag [#allocation4], %s450_s26 }
 0x13e   : > { %p557_p3 = pnand %p958_p13, %p957_p7 }
 0x140   : > { %702 = dma.done.wait (!%p557_p3), %s451_s6, 128  }
 0x141   : > { %704 = vsyncadd (!%p557_p3), %s451_s6, 4294967168  ;;  %s20_s20 = sadd.s32 1, %s727_s20   ;;  %s959_s15 = smov %s711_s16 }
 0x142   : > { %p17_p6 = scmp.ge.s32.totalorder %s20_s20, 4   ;;  %s960_s16 = smov %s715_s17 }
 0x143   : > { %s961_s17 = smov %s814_s29  ;;  %s962_s18 = smov %s723_s19 }
 0x144   : > { %s963_s19 = smov %s965_s23  ;;  %19 = sbr.rel (!%p17_p6) target bundleno = 6 (0x6), region = 81 }
 0x14b   :  { %456 = vsyncpa [#allocation3], 1 }
 0x14c   :  { %458 = vsyncpa [#allocation3 + $0x1], 1 }
 0x14d   :  { %459 = vsyncpa [#allocation4], 1 }
 0x14e   :  { %461 = vsyncpa [#allocation4 + $0x1], 1 }

</bundles_post_ra>
